<compile_context>
chip_gen: v5e
topology: v5e:2x2
jax: 0.10.0
libtpu: 0.0.40
codegen_flags: <defaults>
</compile_context>

<pallas_src>
import functools

import jax
import jax.numpy as jnp
from jax.experimental import pallas as pl
from jax.experimental.pallas import tpu as pltpu


def _autoencoder_kernel(x_ref,      # [input_dim, TILE_B]
                        w1_ref,     # [hidden, input_dim]
                        b1_ref,     # [hidden, 1]
                        w23_ref,    # [hidden, hidden]   (folded Linear(8,3)->Linear(3,8))
                        b23_ref,    # [hidden, 1]
                        w4_ref,     # [input_dim, hidden]
                        b4_ref,     # [input_dim, 1]
                        o_ref):     # [input_dim, TILE_B]
    x = x_ref[...]                                                       # f32, lane-dense

    # encoder Linear(input_dim, 8) + ReLU
    h1 = jnp.dot(w1_ref[...], x, preferred_element_type=jnp.float32) + b1_ref[...]
    h1 = jnp.maximum(h1, 0.0)

    # folded encoder Linear(8,3) -> decoder Linear(3,8) (no activation between), then ReLU
    h2 = jnp.dot(w23_ref[...], h1, preferred_element_type=jnp.float32) + b23_ref[...]
    h2 = jnp.maximum(h2, 0.0)

    # decoder Linear(8, input_dim) + Sigmoid
    y = jnp.dot(w4_ref[...], h2, preferred_element_type=jnp.float32) + b4_ref[...]
    o_ref[...] = jax.nn.sigmoid(y).astype(o_ref.dtype)


@functools.partial(jax.jit, static_argnames=("tile_b",))
def state_autoencoder_forward(x, params, tile_b=None):
    """x: [B, input_dim] float32.  params: PyTorch-style (out, in) weights, (out, 1) biases."""
    B, input_dim = x.shape
    w1, b1 = params["w1"], params["b1"]
    w4, b4 = params["w4"], params["b4"]
    hidden = w1.shape[0]

    # Exact algebraic fold of the activation-free Linear(8,3) -> Linear(3,8) pair.
    w23 = params["w3"] @ params["w2"]                  # [hidden, hidden]
    b23 = params["w3"] @ params["b2"] + params["b3"]   # [hidden, 1]

    # Lane-dense batch tile: multiple of 128; capped so double-buffered x/out tiles stay
    # a few MiB (well under the 32 MiB scoped VMEM default), and big batches stream.
    if tile_b is None:
        tile_b = max(128, min(65536, pl.cdiv(B, 128) * 128))
    n_tiles = pl.cdiv(B, tile_b)
    B_pad = n_tiles * tile_b

    # Pad batch, put it on the lane axis: [input_dim, B_pad].
    x_t = jnp.pad(x.astype(jnp.float32), ((0, B_pad - B), (0, 0))).T

    batch_spec = pl.BlockSpec((input_dim, tile_b), lambda i: (0, i))
    const_spec = lambda shape: pl.BlockSpec(shape, lambda i: (0, 0))  # VMEM-resident params

    out_t = pl.pallas_call(
        _autoencoder_kernel,
        out_shape=jax.ShapeDtypeStruct((input_dim, B_pad), jnp.float32),
        grid=(n_tiles,),
        in_specs=[
            batch_spec,                          # x_T tile (streamed)
            const_spec((hidden, input_dim)),     # w1
            const_spec((hidden, 1)),             # b1
            const_spec((hidden, hidden)),        # w23
            const_spec((hidden, 1)),             # b23
            const_spec((input_dim, hidden)),     # w4
            const_spec((input_dim, 1)),          # b4
        ],
        out_specs=batch_spec,
        compiler_params=pltpu.CompilerParams(
            dimension_semantics=("parallel",),   # lets v7x shard batch tiles across its 2 TCs
        ),
    )(x_t, w1, b1, w23, b23, w4, b4)

    return out_t.T[:B]


def init_params(key, input_dim=5, encoding_dim=3, hidden=8):
    """PyTorch nn.Linear-style init (uniform +-1/sqrt(fan_in)).
    Weights stored as (out, in); biases as (out, 1)."""
    def linear(key, fan_in, fan_out):
        kw, kb = jax.random.split(key)
        bound = 1.0 / jnp.sqrt(fan_in)
        w = jax.random.uniform(kw, (fan_out, fan_in), jnp.float32, -bound, bound)
        b = jax.random.uniform(kb, (fan_out, 1), jnp.float32, -bound, bound)
        return w, b

    k1, k2, k3, k4 = jax.random.split(key, 4)
    w1, b1 = linear(k1, input_dim, hidden)        # encoder Linear(input_dim, 8)
    w2, b2 = linear(k2, hidden, encoding_dim)     # encoder Linear(8, encoding_dim)
    w3, b3 = linear(k3, encoding_dim, hidden)     # decoder Linear(encoding_dim, 8)
    w4, b4 = linear(k4, hidden, input_dim)        # decoder Linear(8, input_dim)
    return dict(w1=w1, b1=b1, w2=w2, b2=b2, w3=w3, b3=b3, w4=w4, b4=b4)


def _reference_forward(x, p):
    """Layer-by-layer reference matching the PyTorch module (x @ W.T + b)."""
    h1 = jnp.maximum(x @ p["w1"].T + p["b1"].T, 0.0)
    enc = h1 @ p["w2"].T + p["b2"].T
    h2 = jnp.maximum(enc @ p["w3"].T + p["b3"].T, 0.0)
    return jax.nn.sigmoid(h2 @ p["w4"].T + p["b4"].T)


if __name__ == "__main__":
    key = jax.random.PRNGKey(0)
    kx, kx2, kp = jax.random.split(key, 3)

    input_dim, encoding_dim = 5, 3
    params = init_params(kp, input_dim=input_dim, encoding_dim=encoding_dim)

    # Small primary check (batch=8, padded to one 128-wide lane tile).
    batch = 8
    x = jax.random.normal(kx, (batch, input_dim), jnp.float32)
    out = jax.block_until_ready(state_autoencoder_forward(x, params))
    ref = _reference_forward(x, params)
    assert out.shape == (batch, input_dim)
    # Folded W23 introduces tiny fp rounding diffs vs. layer-by-layer ref; within 1e-5.
    assert jnp.allclose(out, ref, atol=1e-5, rtol=1e-5)

    # Secondary check: non-multiple batch exercising a multi-step grid + padding/crop.
    batch2 = 300
    x2 = jax.random.normal(kx2, (batch2, input_dim), jnp.float32)
    out2 = jax.block_until_ready(state_autoencoder_forward(x2, params, tile_b=128))
    ref2 = _reference_forward(x2, params)
    assert out2.shape == (batch2, input_dim)
    assert jnp.allclose(out2, ref2, atol=1e-5, rtol=1e-5)

    print("KERNEL_OK")
</pallas_src>

<mosaic_0001>
module attributes {stable_mosaic.version = 11 : i64} {
  func.func @_autoencoder_kernel(%arg0: i32, %arg1: memref<5x128xf32, #tpu.memory_space<vmem>>, %arg2: memref<8x5xf32, #tpu.memory_space<vmem>>, %arg3: memref<8x1xf32, #tpu.memory_space<vmem>>, %arg4: memref<8x8xf32, #tpu.memory_space<vmem>>, %arg5: memref<8x1xf32, #tpu.memory_space<vmem>>, %arg6: memref<5x8xf32, #tpu.memory_space<vmem>>, %arg7: memref<5x1xf32, #tpu.memory_space<vmem>>, %arg8: memref<5x128xf32, #tpu.memory_space<vmem>>) attributes {dimension_semantics = [#tpu.dimension_semantics<parallel>], iteration_bounds = array<i64: 1>, scalar_prefetch = 0 : i64, scratch_operands = 0 : i64, tpu.core_type = #tpu.core_type<tc>, window_params = [{transform_indices = @transform_0, window_bounds = array<i64: 5, 128>}, {pipeline_mode = #tpu.pipeline_mode<synchronous>, transform_indices = @transform_1, window_bounds = array<i64: 8, 5>}, {pipeline_mode = #tpu.pipeline_mode<synchronous>, transform_indices = @transform_2, window_bounds = array<i64: 8, 1>}, {pipeline_mode = #tpu.pipeline_mode<synchronous>, transform_indices = @transform_3, window_bounds = array<i64: 8, 8>}, {pipeline_mode = #tpu.pipeline_mode<synchronous>, transform_indices = @transform_4, window_bounds = array<i64: 8, 1>}, {pipeline_mode = #tpu.pipeline_mode<synchronous>, transform_indices = @transform_5, window_bounds = array<i64: 5, 8>}, {pipeline_mode = #tpu.pipeline_mode<synchronous>, transform_indices = @transform_6, window_bounds = array<i64: 5, 1>}, {transform_indices = @transform_7, window_bounds = array<i64: 5, 128>}]} {
    %c0 = arith.constant 0 : index
    %c0_0 = arith.constant 0 : index
    %0 = vector.load %arg1[%c0, %c0_0] : memref<5x128xf32, #tpu.memory_space<vmem>>, vector<5x128xf32>
    %c0_1 = arith.constant 0 : index
    %c0_2 = arith.constant 0 : index
    %1 = vector.load %arg2[%c0_1, %c0_2] : memref<8x5xf32, #tpu.memory_space<vmem>>, vector<8x5xf32>
    %cst = arith.constant dense<0.000000e+00> : vector<8x128xf32>
    %2 = tpu.matmul %1, %0, %cst {dimension_numbers = #tpu.dot_dimension_numbers<[1], [0], [0], [1], [0, 0, 1, 1], [], []>} : vector<8x5xf32>, vector<5x128xf32>, vector<8x128xf32> -> vector<8x128xf32>
    %c0_3 = arith.constant 0 : index
    %c0_4 = arith.constant 0 : index
    %3 = vector.load %arg3[%c0_3, %c0_4] : memref<8x1xf32, #tpu.memory_space<vmem>>, vector<8x1xf32>
    %4 = vector.broadcast %3 : vector<8x1xf32> to vector<8x128xf32>
    %5 = arith.addf %2, %4 : vector<8x128xf32>
    %cst_5 = arith.constant 0.000000e+00 : f32
    %6 = vector.broadcast %cst_5 : f32 to vector<8x128xf32>
    %7 = arith.maximumf %5, %6 : vector<8x128xf32>
    %c0_6 = arith.constant 0 : index
    %c0_7 = arith.constant 0 : index
    %8 = vector.load %arg4[%c0_6, %c0_7] : memref<8x8xf32, #tpu.memory_space<vmem>>, vector<8x8xf32>
    %cst_8 = arith.constant dense<0.000000e+00> : vector<8x128xf32>
    %9 = tpu.matmul %8, %7, %cst_8 {dimension_numbers = #tpu.dot_dimension_numbers<[1], [0], [0], [1], [0, 0, 1, 1], [], []>} : vector<8x8xf32>, vector<8x128xf32>, vector<8x128xf32> -> vector<8x128xf32>
    %c0_9 = arith.constant 0 : index
    %c0_10 = arith.constant 0 : index
    %10 = vector.load %arg5[%c0_9, %c0_10] : memref<8x1xf32, #tpu.memory_space<vmem>>, vector<8x1xf32>
    %11 = vector.broadcast %10 : vector<8x1xf32> to vector<8x128xf32>
    %12 = arith.addf %9, %11 : vector<8x128xf32>
    %cst_11 = arith.constant 0.000000e+00 : f32
    %13 = vector.broadcast %cst_11 : f32 to vector<8x128xf32>
    %14 = arith.maximumf %12, %13 : vector<8x128xf32>
    %c0_12 = arith.constant 0 : index
    %c0_13 = arith.constant 0 : index
    %15 = vector.load %arg6[%c0_12, %c0_13] : memref<5x8xf32, #tpu.memory_space<vmem>>, vector<5x8xf32>
    %cst_14 = arith.constant dense<0.000000e+00> : vector<5x128xf32>
    %16 = tpu.matmul %15, %14, %cst_14 {dimension_numbers = #tpu.dot_dimension_numbers<[1], [0], [0], [1], [0, 0, 1, 1], [], []>} : vector<5x8xf32>, vector<8x128xf32>, vector<5x128xf32> -> vector<5x128xf32>
    %c0_15 = arith.constant 0 : index
    %c0_16 = arith.constant 0 : index
    %17 = vector.load %arg7[%c0_15, %c0_16] : memref<5x1xf32, #tpu.memory_space<vmem>>, vector<5x1xf32>
    %18 = vector.broadcast %17 : vector<5x1xf32> to vector<5x128xf32>
    %19 = arith.addf %16, %18 : vector<5x128xf32>
    %20 = arith.negf %19 : vector<5x128xf32>
    %21 = math.exp %20 : vector<5x128xf32>
    %cst_17 = arith.constant 1.000000e+00 : f32
    %22 = vector.broadcast %cst_17 : f32 to vector<5x128xf32>
    %23 = arith.addf %22, %21 : vector<5x128xf32>
    %24 = arith.divf %22, %23 : vector<5x128xf32>
    %c0_18 = arith.constant 0 : index
    %c0_19 = arith.constant 0 : index
    %25 = vector.load %arg8[%c0_18, %c0_19] : memref<5x128xf32, #tpu.memory_space<vmem>>, vector<5x128xf32>
    tpu.vector_store %arg8[%c0_18, %c0_19], %24 {strides = array<i32>} : memref<5x128xf32, #tpu.memory_space<vmem>>, vector<5x128xf32>,
    return
  }
  func.func @transform_0(%arg0: i32) -> (i32, i32) {
    %c0_i32 = arith.constant 0 : i32
    %c0_i32_0 = arith.constant 0 : i32
    return %c0_i32, %arg0 : i32, i32
  }
  func.func @transform_1(%arg0: i32) -> (i32, i32) {
    %c0_i32 = arith.constant 0 : i32
    %c0_i32_0 = arith.constant 0 : i32
    %c0_i32_1 = arith.constant 0 : i32
    return %c0_i32, %c0_i32_0 : i32, i32
  }
  func.func @transform_2(%arg0: i32) -> (i32, i32) {
    %c0_i32 = arith.constant 0 : i32
    %c0_i32_0 = arith.constant 0 : i32
    %c0_i32_1 = arith.constant 0 : i32
    return %c0_i32, %c0_i32_0 : i32, i32
  }
  func.func @transform_3(%arg0: i32) -> (i32, i32) {
    %c0_i32 = arith.constant 0 : i32
    %c0_i32_0 = arith.constant 0 : i32
    %c0_i32_1 = arith.constant 0 : i32
    return %c0_i32, %c0_i32_0 : i32, i32
  }
  func.func @transform_4(%arg0: i32) -> (i32, i32) {
    %c0_i32 = arith.constant 0 : i32
    %c0_i32_0 = arith.constant 0 : i32
    %c0_i32_1 = arith.constant 0 : i32
    return %c0_i32, %c0_i32_0 : i32, i32
  }
  func.func @transform_5(%arg0: i32) -> (i32, i32) {
    %c0_i32 = arith.constant 0 : i32
    %c0_i32_0 = arith.constant 0 : i32
    %c0_i32_1 = arith.constant 0 : i32
    return %c0_i32, %c0_i32_0 : i32, i32
  }
  func.func @transform_6(%arg0: i32) -> (i32, i32) {
    %c0_i32 = arith.constant 0 : i32
    %c0_i32_0 = arith.constant 0 : i32
    %c0_i32_1 = arith.constant 0 : i32
    return %c0_i32, %c0_i32_0 : i32, i32
  }
  func.func @transform_7(%arg0: i32) -> (i32, i32) {
    %c0_i32 = arith.constant 0 : i32
    %c0_i32_0 = arith.constant 0 : i32
    return %c0_i32, %arg0 : i32, i32
  }
}

</mosaic_0001>

<bundles_post_ra>
// kernel: state_autoencoder_forward.1
= control target key start
LH: loop header
LB: loop body
LE: loop exit
PB: predicated region body
PF: predicated region fallthrough
CT: control target
= control target key end

     0   :  { %vm38_vm0 = vcmask 1044480   ;;  %vm34_vm1 = vcmask 39936   ;;  %v161_v2 = vmov 0   ;;  %vm70_vm2 = vcmask 64512   ;;  %s226_s0 = inlined_call_operand.vmem [shape: f32[5,128], index: 0, kind: input, shape index: {}]   ;;  %s227_s1 = inlined_call_operand.vmem [shape: f32[8,5], index: 1, kind: input, shape index: {}]   ;;  %s228_s2 = inlined_call_operand.vmem [shape: f32[8,1], index: 2, kind: input, shape index: {}]   ;;  %s229_s4 = inlined_call_operand.vmem [shape: f32[8,1], index: 4, kind: input, shape index: {}]   ;;  %s230_s3 = inlined_call_operand.vmem [shape: f32[8,8], index: 3, kind: input, shape index: {}]   ;;  %s231_s6 = inlined_call_operand.vmem [shape: f32[5,1], index: 6, kind: input, shape index: {}]   ;;  %s232_s5 = inlined_call_operand.vmem [shape: f32[5,8], index: 5, kind: input, shape index: {}]   ;;  %s233_s7 = inlined_call_operand.vmem [shape: f32[5,128], index: 7, kind: output, shape index: {}]  }
   0x1   :  { %v26_v0 = vld [vmem:[%s226_s0] sm:$0x1f]  ;;  %155 = vset.pattern.permute.xlu0 %v161_v2  ;;  %156 = vset.pattern.permute.xlu1 %v161_v2 }
   0x2   :  { %v27_v1 = vld [vmem:[%s227_s1] sm:$0xff]  ;;  %149 = vmatpush.msk.msra.mxu0 %vm38_vm0, %v26_v0 }
   0x3   :  { %v28_v3 = vld [vmem:[%s228_s2] sm:$0xff]  ;;  %150 = vmatmul.msk.f32.vlgmr.msra.gmra.mxu0 %vm34_vm1, %v27_v1 }
   0x4   :  { %31 = vperm.xlu0 %155, %v28_v3   ;;  %v64_v4 = vld [vmem:[%s229_s4] sm:$0xff] }
   0x5   :  { %v63_v9 = vld [vmem:[%s230_s3] sm:$0xff] }
   0x6   :  { %v96_v10 = vld [vmem:[%s231_s6] sm:$0x1f] }
   0x7   :  { %99 = vperm.xlu1 %156, %v96_v10   ;;  %v95_v15 = vld [vmem:[%s232_s5] sm:$0x1f] }
   0xc   :  { %67 = vperm.xlu0 %155, %v64_v4  }
  0x76   :  { %v32_v5 = vpop.permute.xlu0 %31 }
  0x79   :  { %v100_v16 = vpop.permute.xlu1 %99 }
  0x7e   :  { %v68_v11 = vpop.permute.xlu0 %67 }
  0x80   :  { %v59_v6 = vpop.f32.mrf.mxu0 }
  0x81   :  { %v60_v7 = vadd.f32 %v59_v6, %v32_v5 }
  0x83   :  { %v62_v8 = vmax.f32 %v60_v7, 0.0 }
  0x85   :  { %89 = vmatpush.msra.mxu1 %v62_v8 }
  0x86   :  { %151 = vmatmul.msk.f32.vlgmr.msra.gmra.mxu1 %vm70_vm2, %v63_v9 }
 0x103   :  { %v91_v12 = vpop.f32.mrf.mxu1 }
 0x104   :  { %v92_v13 = vadd.f32 %v91_v12, %v68_v11 }
 0x106   :  { %v94_v14 = vmax.f32 %v92_v13, 0.0 }
 0x108   :  { %120 = vmatpush.msra.mxu2 %v94_v14 }
 0x109   :  { %152 = vmatmul.msk.f32.vlgmr.msra.gmra.mxu2 %vm70_vm2, %v95_v15 }
 0x18c   :  { %v122_v17 = vpop.f32.mrf.mxu2 }
 0x18d   :  { %v123_v18 = vadd.f32 %v122_v17, %v100_v16 }
 0x18f   :  { %v153_v19 = vmul.f32 -1.442695, %v123_v18 }
 0x191   :  { %157 = vpow2.f32 %v153_v19 }
 0x197   :  { %v158_v20 = vpop.eup %157 }
 0x198   :  { %v128_v21 = vadd.f32 1.0, %v158_v20 }
 0x19a   :  { %159 = vrcp.f32 %v128_v21  ;;  %v140_v25 = vand.u32 2147483648, %v128_v21  ;;  %v138_v27 = vand.u32 2147483647, %v128_v21  ;;  %vm134_vm4 = vweird.f32 %v128_v21 }
 0x19c   :  { %v141_v29 = vor.u32 1.1754944e-38, %v140_v25  ;;  %vm139_vm6 = vcmp.eq.f32.partialorder %v138_v27, 8.507059e+37 }
 0x1a0   :  { %v160_v22 = vpop.eup %159 }
 0x1a1   :  { %v130_v23 = vmul.f32 %v160_v22, %v128_v21  ;;  %vm135_vm3 = vweird.f32 %v160_v22 }
 0x1a2   :  { %vm136_vm5 = vmor %vm134_vm4, %vm135_vm3 }
 0x1a3   :  { %v131_v24 = vsub.f32 1.0, %v130_v23 }
 0x1a5   :  { %v132_v26 = vmul.f32 %v160_v22, %v131_v24 }
 0x1a7   :  { %v133_v28 = vadd.f32 %v160_v22, %v132_v26 }
 0x1a9   :  { %v137_v30 = vsel %vm136_vm5, %v160_v22, %v133_v28 }
 0x1aa   :  { %v142_v31 = vsel %vm139_vm6, %v141_v29, %v137_v30 }
 0x1ab   :  { %144 = vst [vmem:[%s233_s7] sm:$0x1f] %v142_v31 }

</bundles_post_ra>
